<compile_context>
chip_gen: v6e
topology: v6e:2x2x1
jax: 0.10.0
libtpu: 0.0.40
codegen_flags: <defaults>
</compile_context>

<pallas_src>
import math

import jax
import jax.numpy as jnp
from jax.experimental import pallas as pl
from jax.experimental.pallas import tpu as pltpu

_NEG_FILL = -1e30  # finite "minus infinity": exp underflows to 0, never NaN


def _round_up(x, m):
    return ((x + m - 1) // m) * m


# ---------------------------------------------------------------------------
# Kernel 1: feature projection  z = h @ W^T   (computed once, tiled over rows)
#           bf16 MXU inputs, f32 accumulation, bf16 output.
# ---------------------------------------------------------------------------
def _project_kernel(h_ref, wt_ref, z_ref):
    z_ref[...] = jnp.dot(h_ref[...].astype(jnp.bfloat16),
                         wt_ref[...].astype(jnp.bfloat16),
                         preferred_element_type=jnp.float32
                         ).astype(jnp.bfloat16)


# ---------------------------------------------------------------------------
# Kernel 2: masked attention + aggregation, flash-style online softmax with
#           block-sparsity skipping.  Grid = (dst_blocks, src_blocks).
# ---------------------------------------------------------------------------
def _gat_attn_kernel(cnt_ref, zq_ref, zk_ref, adjt_ref, out_ref,
                     m_sc, l_sc, acc_sc):
    q = pl.program_id(0)
    k = pl.program_id(1)
    nk = pl.num_programs(1)

    @pl.when(k == 0)
    def _():
        m_sc[...] = jnp.full_like(m_sc, _NEG_FILL)
        l_sc[...] = jnp.zeros_like(l_sc)
        acc_sc[...] = jnp.zeros_like(acc_sc)

    # Skip the whole step (mask, exp, both matmuls, m/l/acc update) for tiles
    # that contain no edges: near-linear win in block sparsity on real graphs.
    @pl.when(cnt_ref[q * nk + k] > 0)
    def _():
        zq = zq_ref[...]                                   # (TQ, D) bf16 dst
        zk = zk_ref[...]                                   # (TK, D) bf16 src

        # scores[v, u] = <z_v, z_u>: contract dim 1 of both operands (no
        # transpose materialized); bf16 x bf16 -> f32 accumulation on the MXU.
        s = jax.lax.dot_general(zq, zk, (((1,), (1,)), ((), ())),
                                preferred_element_type=jnp.float32)  # (TQ,TK)
        mask = adjt_ref[...] > 0                           # int8 A^T -> bool
        s = jnp.where(mask, s, _NEG_FILL)                  # single masking step

        # Online softmax update (f32 state).
        m_prev = m_sc[...]
        m_new = jnp.maximum(m_prev, jnp.max(s, axis=-1, keepdims=True))
        corr = jnp.exp(m_prev - m_new)
        p = jnp.exp(s - m_new)                             # masked entries -> 0
        # Rows that have not seen any edge yet keep m_new at the fill value;
        # for them every masked entry would give exp(0)=1.  Zero those rows
        # (cheap (TQ,1)-broadcast multiply) so l/acc stay exactly 0.
        row_live = (m_new > 0.5 * _NEG_FILL).astype(jnp.float32)
        p = p * row_live

        l_sc[...] = corr * l_sc[...] + jnp.sum(p, axis=-1, keepdims=True)
        acc_sc[...] = corr * acc_sc[...] + jnp.dot(
            p.astype(jnp.bfloat16), zk, preferred_element_type=jnp.float32)
        m_sc[...] = m_new

    @pl.when(k == nk - 1)
    def _():
        # Finalize runs once per dst block: exact reciprocal is essentially
        # free here and tightens accuracy; l==0 rows (isolated/padded) have
        # acc==0 so they emit 0, never NaN/Inf.
        l = l_sc[...]
        l_inv = pl.reciprocal(jnp.where(l > 0.0, l, 1.0), approx=False)
        out_ref[...] = (acc_sc[...] * l_inv).astype(out_ref.dtype)


# ---------------------------------------------------------------------------
# Wrapper: padding to lane-dense / tile-aligned shapes, two pallas_calls.
# ---------------------------------------------------------------------------
def gat_layer_forward(h, w_fc, adj, *, tile=1024):
    """h: (N, in_dim) f32, w_fc: (out_dim, in_dim) f32,
    adj: (N, N), adj[u, v] != 0 means edge u -> v (self loops expected)."""
    n, in_dim = h.shape
    out_dim = w_fc.shape[0]

    d_in = _round_up(in_dim, 128)
    # v6e/v7x MXUs are 2x256x256: pad the feature dim to 256 multiples once it
    # exceeds one 128-lane group; 128 stays native for small dims and v5e.
    d_out = 128 if out_dim <= 128 else _round_up(out_dim, 256)

    n128 = _round_up(n, 128)
    tq = min(tile, n128)          # dst (query) tile: acc/out resident
    tk = min(tile, n128)          # src (key) tile: tunes adj/zk DMA size
    # v7x has 2 TensorCores: guarantee >= 2 dst blocks when possible so the
    # "parallel" dst axis actually shards across both cores.
    if n128 // tq < 2 and tq > 128:
        tq //= 2
    n_pad = _round_up(n, math.lcm(tq, tk))
    nqb = n_pad // tq
    nkb = n_pad // tk

    # Per-step VMEM (double-buffered zq/zk/adj/out + f32 acc) at tq=tk=1024,
    # d_out=128 is ~5 MiB, well under the 32 MiB scoped limit (re-derive on
    # v7x's 64 MiB physical VMEM before growing tiles / d_out further).
    vmem_limit = 32 * 1024 * 1024

    # Zero-pad features / weights to lane-dense shapes (zeros contribute 0).
    h_pad = jnp.zeros((n_pad, d_in), jnp.float32).at[:n, :in_dim].set(
        h.astype(jnp.float32))
    wt_pad = jnp.zeros((d_in, d_out), jnp.float32).at[:in_dim, :out_dim].set(
        w_fc.T.astype(jnp.float32))
    # Transposed adjacency (row v lists the in-neighbours u of v), int8.
    # Compare -> int8 -> transpose -> pad in one chain so XLA fuses it into a
    # single int8 N^2 buffer (no per-tile XLU transpose, 4x fewer DMA bytes).
    adj_t = jnp.zeros((n_pad, n_pad), jnp.int8).at[:n, :n].set(
        (adj > 0).astype(jnp.int8).T)

    # Block-level "tile has edges" table for sparsity skipping (SMEM, 1D to
    # avoid the 2D SMEM padding blow-up).
    cnt = adj_t.reshape(nqb, tq, nkb, tk).astype(jnp.int32).sum(axis=(1, 3))
    cnt = cnt.reshape(-1).astype(jnp.int32)

    z = pl.pallas_call(
        _project_kernel,
        out_shape=jax.ShapeDtypeStruct((n_pad, d_out), jnp.bfloat16),
        grid_spec=pltpu.PrefetchScalarGridSpec(
            num_scalar_prefetch=0,
            grid=(n_pad // tq,),
            in_specs=[
                pl.BlockSpec((tq, d_in), lambda i: (i, 0)),
                pl.BlockSpec((d_in, d_out), lambda i: (0, 0)),
            ],
            out_specs=pl.BlockSpec((tq, d_out), lambda i: (i, 0)),
        ),
        compiler_params=pltpu.CompilerParams(
            dimension_semantics=("parallel",),
            vmem_limit_bytes=vmem_limit),
    )(h_pad, wt_pad)

    out = pl.pallas_call(
        _gat_attn_kernel,
        out_shape=jax.ShapeDtypeStruct((n_pad, d_out), jnp.float32),
        grid_spec=pltpu.PrefetchScalarGridSpec(
            num_scalar_prefetch=1,                       # cnt table -> SMEM
            grid=(nqb, nkb),
            in_specs=[
                pl.BlockSpec((tq, d_out), lambda q, k, cnt: (q, 0)),  # z dst
                pl.BlockSpec((tk, d_out), lambda q, k, cnt: (k, 0)),  # z src
                pl.BlockSpec((tq, tk), lambda q, k, cnt: (q, k)),     # A^T i8
            ],
            out_specs=pl.BlockSpec((tq, d_out), lambda q, k, cnt: (q, 0)),
            scratch_shapes=[
                pltpu.VMEM((tq, 1), jnp.float32),      # running max m
                pltpu.VMEM((tq, 1), jnp.float32),      # running sum l
                pltpu.VMEM((tq, d_out), jnp.float32),  # output accumulator
            ]),
        compiler_params=pltpu.CompilerParams(
            dimension_semantics=("parallel", "arbitrary"),
            vmem_limit_bytes=vmem_limit),
    )(cnt, z, z, adj_t)

    return out[:n, :out_dim]


if __name__ == "__main__":
    key = jax.random.PRNGKey(0)
    k_h, k_w, k_a, k_attn = jax.random.split(key, 4)

    N = 16        # number of graph nodes
    IN_DIM = 8
    OUT_DIM = 8

    # Node features.
    h = jax.random.normal(k_h, (N, IN_DIM), dtype=jnp.float32)

    # nn.Linear(in_dim, out_dim, bias=False): weight shape (out_dim, in_dim).
    bound_fc = 1.0 / jnp.sqrt(jnp.float32(IN_DIM))
    w_fc = jax.random.uniform(k_w, (OUT_DIM, IN_DIM), dtype=jnp.float32,
                              minval=-bound_fc, maxval=bound_fc)

    # attn_fc exists in __init__ but is unused in forward; init for parity.
    bound_attn = 1.0 / jnp.sqrt(jnp.float32(2 * OUT_DIM))
    w_attn = jax.random.uniform(k_attn, (1, 2 * OUT_DIM), dtype=jnp.float32,
                                minval=-bound_attn, maxval=bound_attn)
    del w_attn  # not used by forward

    # Deterministic symmetric adjacency with forced self-loops
    # (Adj_norm - diag(Adj_norm) + I).
    raw = jax.random.uniform(k_a, (N, N), dtype=jnp.float32)
    a_sym = ((raw + raw.T) * 0.5 > 0.6).astype(jnp.float32)
    eye = jnp.eye(N, dtype=jnp.float32)
    adj = a_sym * (1.0 - eye) + eye

    out = gat_layer_forward(h, w_fc, adj)
    out = jax.block_until_ready(out)

    # Pure-JAX reference check (mirrors the kernel's bf16 projection so the
    # comparison isolates the attention math; scores/softmax in f32).
    z_ref = jnp.dot(h.astype(jnp.bfloat16), w_fc.T.astype(jnp.bfloat16),
                    preferred_element_type=jnp.float32
                    ).astype(jnp.bfloat16).astype(jnp.float32)
    s_ref = z_ref @ z_ref.T                 # s_ref[v, u] = <z_v, z_u>
    mask = adj.T > 0                        # row v = in-neighbours of v
    sc = jnp.where(mask, s_ref, -jnp.inf)
    p = jnp.exp(sc - jnp.max(sc, axis=-1, keepdims=True))
    p = jnp.where(mask, p, 0.0)
    alpha = p / jnp.sum(p, axis=-1, keepdims=True)
    ref = alpha @ z_ref
    # Tolerance covers the bf16 cast of p before the PV matmul in the kernel.
    assert jnp.allclose(out, ref, atol=1e-2, rtol=1e-2), "mismatch vs JAX reference"

    print("KERNEL_OK")
</pallas_src>

<mosaic_0001>
module attributes {stable_mosaic.version = 11 : i64} {
  func.func @_project_kernel(%arg0: i32, %arg1: memref<128x128xf32, #tpu.memory_space<vmem>>, %arg2: memref<128x128xf32, #tpu.memory_space<vmem>>, %arg3: memref<128x128xbf16, #tpu.memory_space<vmem>>) attributes {dimension_semantics = [#tpu.dimension_semantics<parallel>], iteration_bounds = array<i64: 1>, scalar_prefetch = 0 : i64, scratch_operands = 0 : i64, tpu.core_type = #tpu.core_type<tc>, window_params = [{transform_indices = @transform_0, window_bounds = array<i64: 128, 128>}, {pipeline_mode = #tpu.pipeline_mode<synchronous>, transform_indices = @transform_1, window_bounds = array<i64: 128, 128>}, {transform_indices = @transform_2, window_bounds = array<i64: 128, 128>}]} {
    %c0 = arith.constant 0 : index
    %c0_0 = arith.constant 0 : index
    %0 = vector.load %arg1[%c0, %c0_0] : memref<128x128xf32, #tpu.memory_space<vmem>>, vector<128x128xf32>
    %1 = arith.truncf %0 : vector<128x128xf32> to vector<128x128xbf16>
    %c0_1 = arith.constant 0 : index
    %c0_2 = arith.constant 0 : index
    %2 = vector.load %arg2[%c0_1, %c0_2] : memref<128x128xf32, #tpu.memory_space<vmem>>, vector<128x128xf32>
    %3 = arith.truncf %2 : vector<128x128xf32> to vector<128x128xbf16>
    %cst = arith.constant dense<0.000000e+00> : vector<128x128xf32>
    %4 = tpu.matmul %1, %3, %cst {dimension_numbers = #tpu.dot_dimension_numbers<[1], [0], [0], [1], [0, 0, 1, 1], [], []>} : vector<128x128xbf16>, vector<128x128xbf16>, vector<128x128xf32> -> vector<128x128xf32>
    %5 = arith.truncf %4 : vector<128x128xf32> to vector<128x128xbf16>
    %c0_3 = arith.constant 0 : index
    %c0_4 = arith.constant 0 : index
    %6 = vector.load %arg3[%c0_3, %c0_4] : memref<128x128xbf16, #tpu.memory_space<vmem>>, vector<128x128xbf16>
    tpu.vector_store %arg3[%c0_3, %c0_4], %5 {strides = array<i32>} : memref<128x128xbf16, #tpu.memory_space<vmem>>, vector<128x128xbf16>,
    return
  }
  func.func @transform_0(%arg0: i32) -> (i32, i32) {
    %c0_i32 = arith.constant 0 : i32
    %c0_i32_0 = arith.constant 0 : i32
    return %arg0, %c0_i32 : i32, i32
  }
  func.func @transform_1(%arg0: i32) -> (i32, i32) {
    %c0_i32 = arith.constant 0 : i32
    %c0_i32_0 = arith.constant 0 : i32
    %c0_i32_1 = arith.constant 0 : i32
    return %c0_i32, %c0_i32_0 : i32, i32
  }
  func.func @transform_2(%arg0: i32) -> (i32, i32) {
    %c0_i32 = arith.constant 0 : i32
    %c0_i32_0 = arith.constant 0 : i32
    return %arg0, %c0_i32 : i32, i32
  }
}

</mosaic_0001>

<bundles_post_ra>
// kernel: tpu_custom_call.1
= control target key start
LH: loop header
LB: loop body
LE: loop exit
PB: predicated region body
PF: predicated region fallthrough
CT: control target
= control target key end

     0   :  { %7 = vsyncpa [#allocation3], 0  ;;  %s531_s0 = inlined_call_operand.hbm [shape: f32[128,128], index: 0, kind: input, shape index: {}]   ;;  %s532_s1 = inlined_call_operand.hbm [shape: f32[128,128], index: 1, kind: input, shape index: {}]   ;;  %s533_s2 = inlined_call_operand.hbm [shape: bf16[128,128], index: 2, kind: output, shape index: {}]  }
   0x1   :  { %8 = vsyncpa [#allocation6], 0 }
   0x2   :  { %9 = vsyncpa [#allocation4], 0  ;;  %s500_s9 = smov [#allocation2]  }
   0x3   :  { %s15_s10 = sshll.u32 %s500_s9, 4  ;;  %s16_s10 = int_to_ptr.vmem [resolvable:$true] %s15_s10 }
   0x4   :  { %s442_s11 = scalar_lea.vmem %s16_s10, 2048  ;;  %p447_p1 = scmp.lt.s32.totalorder %s16_s10, %s16_s10 }
   0x5   :  { %p443_p0 = scmp.ne.s32.totalorder %s16_s10, %s442_s11  ;;  %p448_p2 = scmp.lt.s32.totalorder %s442_s11, %s442_s11 }
   0x7   :  { %p449_p3 = por %p448_p2, %p447_p1 }
   0x9   :  { %p450_p4 = pnand %p449_p3, %p443_p0 }
   0xb   :  { %453 = shalt.err (!%p450_p4)
}
   0xc   :  { %s501_s12 = smov 128   ;;  %s502_s13 = smov 8  }
   0xd   :  { %21 = dma.hbm_to_vmem [thread:$0]  %s531_s0, 2048, %s16_s10, [#allocation3], %s501_s12, %s501_s12, %s502_s13  }
   0xe   :  { %s503_s16 = smov [#allocation5]  }
   0xf   :  { %s27_s17 = sshll.u32 %s503_s16, 4  ;;  %s28_s17 = int_to_ptr.vmem [resolvable:$true] %s27_s17 }
  0x10   :  { %s462_s18 = scalar_lea.vmem %s28_s17, 2048  ;;  %p467_p6 = scmp.lt.s32.totalorder %s28_s17, %s28_s17 }
  0x11   :  { %p463_p5 = scmp.ne.s32.totalorder %s28_s17, %s462_s18  ;;  %p468_p7 = scmp.lt.s32.totalorder %s462_s18, %s462_s18 }
  0x13   :  { %p469_p8 = por %p468_p7, %p467_p6 }
  0x15   :  { %p470_p9 = pnand %p469_p8, %p463_p5 }
  0x17   :  { %473 = shalt.err (!%p470_p9)
}
  0x18   :  { %33 = dma.hbm_to_vmem [thread:$0]  %s532_s1, 2048, %s28_s17, [#allocation6], %s501_s12, %s501_s12, %s502_s13  }
  0x19   :  { %494 = dma.done.wait [#allocation3], 2048  }
  0x1a   :  { %495 = vsyncadd [#allocation3], 4294965248 }
  0x1b   :  { %496 = dma.done.wait [#allocation6], 2048  }
  0x1c   :  { %497 = vsyncadd [#allocation6], 4294965248  ;;  %v79_v0 = vld [vmem:[#allocation5 + $0x70] sm:$0xff]  ;;  %v80_v1 = vld [vmem:[#allocation5 + $0x78] sm:$0xff]  ;;  %s504_s0 = smov [#allocation7]  }
  0x1d   :  { %v77_v2 = vld [vmem:[#allocation5 + $0x60] sm:$0xff]  ;;  %v88_v3 = vpack.c.bf16 %v80_v1, %v79_v0  ;;  %v78_v4 = vld [vmem:[#allocation5 + $0x68] sm:$0xff]  ;;  %v75_v6 = vld [vmem:[#allocation5 + $0x50] sm:$0xff]  ;;  %s271_s1 = sshll.u32 %s504_s0, 4  ;;  %s272_s1 = int_to_ptr.vmem [resolvable:$true] %s271_s1 }
  0x1e   :  { %v87_v5 = vpack.c.bf16 %v78_v4, %v77_v2  ;;  %v76_v7 = vld [vmem:[#allocation5 + $0x58] sm:$0xff]  ;;  %v73_v9 = vld [vmem:[#allocation5 + $0x40] sm:$0xff]  ;;  %v42_v11 = vld [vmem:[#allocation2 + $0x8] sm:$0xff]  ;;  %s474_s21 = scalar_lea.vmem %s272_s1, 1024  ;;  %p479_p11 = scmp.lt.s32.totalorder %s272_s1, %s272_s1 }
  0x1f   :  { %379 = vmatprep.subr.bf16.mxu0 %v88_v3  ;;  %411 = vmatprep.subr.bf16.mxu1 %v88_v3  ;;  %v86_v8 = vpack.c.bf16 %v76_v7, %v75_v6  ;;  %v41_v10 = vld [vmem:[#allocation2] sm:$0xff]  ;;  %v74_v12 = vld [vmem:[#allocation5 + $0x48] sm:$0xff]  ;;  %v71_v18 = vld [vmem:[#allocation5 + $0x30] sm:$0xff]  ;;  %p475_p10 = scmp.ne.s32.totalorder %s272_s1, %s474_s21  ;;  %p480_p12 = scmp.lt.s32.totalorder %s474_s21, %s474_s21 }
  0x20   :  { %380 = vmatpush3.bf16.msra.mxu0 %v88_v3  ;;  %419 = vmatpush3.bf16.msra.mxu1 %v88_v3  ;;  %v57_v13 = vpack.c.bf16 %v42_v11, %v41_v10  ;;  %v49_v14 = vld [vmem:[#allocation2 + $0x40] sm:$0xff]  ;;  %v50_v15 = vld [vmem:[#allocation2 + $0x48] sm:$0xff]  ;;  %v85_v17 = vpack.c.bf16 %v74_v12, %v73_v9  ;;  %v72_v19 = vld [vmem:[#allocation5 + $0x38] sm:$0xff] }
  0x21   :  { %381 = vmatprep.subr.bf16.mxu0 %v87_v5  ;;  %412 = vmatprep.subr.bf16.mxu1 %v87_v5  ;;  %v61_v16 = vpack.c.bf16 %v50_v15, %v49_v14  ;;  %v84_v20 = vpack.c.bf16 %v72_v19, %v71_v18  ;;  %v69_v21 = vld [vmem:[#allocation5 + $0x20] sm:$0xff]  ;;  %v70_v22 = vld [vmem:[#allocation5 + $0x28] sm:$0xff]  ;;  %v67_v24 = vld [vmem:[#allocation5 + $0x10] sm:$0xff]  ;;  %p481_p13 = por %p480_p12, %p479_p11 }
  0x22   :  { %395 = vmatprep.mubr.bf16.mxu0 %v57_v13  ;;  %v83_v23 = vpack.c.bf16 %v70_v22, %v69_v21  ;;  %v68_v25 = vld [vmem:[#allocation5 + $0x18] sm:$0xff]  ;;  %v65_v27 = vld [vmem:[#allocation5] sm:$0xff]  ;;  %v66_v28 = vld [vmem:[#allocation5 + $0x8] sm:$0xff] }
  0x23   :  { %403 = vmatprep.mubr.bf16.mxu1 %v61_v16  ;;  %v82_v26 = vpack.c.bf16 %v68_v25, %v67_v24  ;;  %v81_v29 = vpack.c.bf16 %v66_v28, %v65_v27  ;;  %v43_v30 = vld [vmem:[#allocation2 + $0x10] sm:$0xff]  ;;  %v44_v31 = vld [vmem:[#allocation2 + $0x18] sm:$0xff]  ;;  %v45_v34 = vld [vmem:[#allocation2 + $0x20] sm:$0xff]  ;;  %p482_p0 = pnand %p481_p13, %p475_p10 }
  0x24   :  { %382 = vmatpush3.bf16.msra.mxu0 %v87_v5  ;;  %420 = vmatpush3.bf16.msra.mxu1 %v87_v5  ;;  %v51_v32 = vld [vmem:[#allocation2 + $0x50] sm:$0xff]  ;;  %v52_v33 = vld [vmem:[#allocation2 + $0x58] sm:$0xff]  ;;  %v46_v35 = vld [vmem:[#allocation2 + $0x28] sm:$0xff]  ;;  %v58_v38 = vpack.c.bf16 %v44_v31, %v43_v30 }
  0x25   :  { %383 = vmatprep.subr.bf16.mxu0 %v86_v8  ;;  %413 = vmatprep.subr.bf16.mxu1 %v86_v8  ;;  %v53_v36 = vld [vmem:[#allocation2 + $0x60] sm:$0xff]  ;;  %v54_v37 = vld [vmem:[#allocation2 + $0x68] sm:$0xff]  ;;  %v62_v39 = vpack.c.bf16 %v52_v33, %v51_v32  ;;  %v59_v40 = vpack.c.bf16 %v46_v35, %v45_v34  ;;  %v47_v42 = vld [vmem:[#allocation2 + $0x30] sm:$0xff] }
  0x26   :  { %v63_v41 = vpack.c.bf16 %v54_v37, %v53_v36  ;;  %v48_v43 = vld [vmem:[#allocation2 + $0x38] sm:$0xff]  ;;  %v55_v44 = vld [vmem:[#allocation2 + $0x70] sm:$0xff] }
  0x27   :  { %v56_v45 = vld [vmem:[#allocation2 + $0x78] sm:$0xff]  ;;  %v60_v46 = vpack.c.bf16 %v48_v43, %v47_v42 }
  0x28   :  { %384 = vmatpush3.bf16.msra.mxu0 %v86_v8  ;;  %421 = vmatpush3.bf16.msra.mxu1 %v86_v8  ;;  %v64_v47 = vpack.c.bf16 %v56_v45, %v55_v44 }
  0x29   :  { %385 = vmatprep.subr.bf16.mxu0 %v85_v17  ;;  %414 = vmatprep.subr.bf16.mxu1 %v85_v17 }
  0x2c   :  { %386 = vmatpush3.bf16.msra.mxu0 %v85_v17  ;;  %422 = vmatpush3.bf16.msra.mxu1 %v85_v17 }
  0x2d   :  { %387 = vmatprep.subr.bf16.mxu0 %v84_v20  ;;  %415 = vmatprep.subr.bf16.mxu1 %v84_v20 }
  0x30   :  { %388 = vmatpush3.bf16.msra.mxu0 %v84_v20  ;;  %423 = vmatpush3.bf16.msra.mxu1 %v84_v20 }
  0x31   :  { %389 = vmatprep.subr.bf16.mxu0 %v83_v23  ;;  %416 = vmatprep.subr.bf16.mxu1 %v83_v23 }
  0x34   :  { %390 = vmatpush3.bf16.msra.mxu0 %v83_v23  ;;  %424 = vmatpush3.bf16.msra.mxu1 %v83_v23 }
  0x35   :  { %391 = vmatprep.subr.bf16.mxu0 %v82_v26  ;;  %417 = vmatprep.subr.bf16.mxu1 %v82_v26 }
  0x38   :  { %392 = vmatpush3.bf16.msra.mxu0 %v82_v26  ;;  %425 = vmatpush3.bf16.msra.mxu1 %v82_v26 }
  0x39   :  { %393 = vmatprep.subr.bf16.mxu0 %v81_v29  ;;  %418 = vmatprep.subr.bf16.mxu1 %v81_v29 }
  0x3c   :  { %394 = vmatpush3.bf16.msra.mxu0 %v81_v29  ;;  %426 = vmatpush3.bf16.msra.mxu1 %v81_v29 }
  0x3f   :  { %396 = vmatmul.mubr.bf16.vlgmr.msra.gmra.mxu0 %v58_v38  ;;  %404 = vmatmul.mubr.bf16.vlgmr.msra.gmra.mxu1 %v62_v39 }
  0x40   :  { %399 = vmatprep.mubr.bf16.mxu0 %v59_v40  ;;  %407 = vmatprep.mubr.bf16.mxu1 %v63_v41 }
  0x47   :  { %400 = vmatmul.mubr.bf16.gmra.mxu0 %v60_v46  ;;  %408 = vmatmul.mubr.bf16.gmra.mxu1 %v64_v47 }
  0xff   :  { %v397_v48 = vpop.f32.mrf.mxu0  ;;  %v405_v49 = vpop.f32.mrf.mxu1 }
 0x101   :  { %v123_v50 = vpop.f32.mrf.mxu0  ;;  %v155_v51 = vpop.f32.mrf.mxu1 }
 0x103   :  { %v398_v52 = vpop.f32.mrf.mxu0  ;;  %v406_v53 = vpop.f32.mrf.mxu1 }
 0x104   :  { %v324_v54 = vpack.c.bf16 %v398_v52, %v397_v48  ;;  %v344_v55 = vpack.c.bf16 %v406_v53, %v405_v49 }
 0x105   :  { %v126_v56 = vpop.f32.mrf.mxu0  ;;  %v158_v57 = vpop.f32.mrf.mxu1 }
 0x106   :  { %356 = vst [vmem:[#allocation7 + $0x8] sm:$0xff] %v324_v54   ;;  %360 = vst [vmem:[#allocation7 + $0x28] sm:$0xff] %v344_v55   ;;  %v319_v58 = vpack.c.bf16 %v126_v56, %v123_v50  ;;  %v339_v59 = vpack.c.bf16 %v158_v57, %v155_v51 }
 0x107   :  { %v401_v60 = vpop.f32.mrf.mxu0  ;;  %v409_v61 = vpop.f32.mrf.mxu1 }
 0x108   :  { %320 = vst [vmem:[#allocation7] sm:$0xff] %v319_v58   ;;  %359 = vst [vmem:[#allocation7 + $0x20] sm:$0xff] %v339_v59  }
 0x109   :  { %v139_v62 = vpop.f32.mrf.mxu0  ;;  %v171_v63 = vpop.f32.mrf.mxu1 }
 0x10b   :  { %v402_v0 = vpop.f32.mrf.mxu0  ;;  %v410_v1 = vpop.f32.mrf.mxu1 }
 0x10c   :  { %v334_v2 = vpack.c.bf16 %v402_v0, %v401_v60  ;;  %v354_v3 = vpack.c.bf16 %v410_v1, %v409_v61 }
 0x10d   :  { %v142_v4 = vpop.f32.mrf.mxu0  ;;  %v174_v5 = vpop.f32.mrf.mxu1 }
 0x10e   :  { %358 = vst [vmem:[#allocation7 + $0x18] sm:$0xff] %v334_v2   ;;  %362 = vst [vmem:[#allocation7 + $0x38] sm:$0xff] %v354_v3   ;;  %v329_v6 = vpack.c.bf16 %v142_v4, %v139_v62  ;;  %v349_v7 = vpack.c.bf16 %v174_v5, %v171_v63 }
 0x110   :  { %357 = vst [vmem:[#allocation7 + $0x10] sm:$0xff] %v329_v6   ;;  %361 = vst [vmem:[#allocation7 + $0x30] sm:$0xff] %v349_v7  }
 0x111   :  { %485 = shalt.err (!%p482_p0)
}
 0x112   :  { %s505_s22 = smov 64   ;;  %s506_s23 = smov 4  }
 0x113   :  { %277 = dma.vmem_to_hbm [thread:$0]  %s272_s1, 1024, %s533_s2, [#allocation4], %s505_s22, %s505_s22, %s506_s23  }
 0x114   :  { %498 = dma.done.wait [#allocation4], 1024  }
 0x115   :  { %499 = vsyncadd [#allocation4], 4294966272 }
 0x116   :  { %281 = vsyncpa [#allocation3], 1 }
 0x117   :  { %282 = vsyncpa [#allocation6], 1 }
 0x118   :  { %283 = vsyncpa [#allocation4], 1 }

</bundles_post_ra>
